<compile_context>
chip_gen: v7x
topology: tpu7x:2x2x1
jax: 0.10.0
libtpu: 0.0.40
codegen_flags: <defaults>
</compile_context>

<pallas_src>
import functools

import jax
import jax.numpy as jnp
from jax.experimental import pallas as pl
from jax.experimental.pallas import tpu as pltpu

# ---- model dims (facebook/esm2_t6_8M_UR50D: hidden_size = 320) ----
HIDDEN = 320
MLP = 256
NUM_LABELS = 2
VOCAB = 33


def _round_up(x, m):
    return (x + m - 1) // m * m


def classifier_head_kernel(seq_ref, w1_ref, b1_ref, w2_ref, b2_ref, out_ref,
                           acc_ref, *, inv_seq_len):
    # seq_ref: [BB, ST, H] chunk of sequence_output (native dtype)
    # acc_ref: [BB, H] f32 pooled-sum accumulator (persists across seq steps)
    s = pl.program_id(1)

    @pl.when(s == 0)
    def _():
        acc_ref[...] = jnp.zeros_like(acc_ref)

    # Accumulate pooled sum in f32 (upcast from the streamed chunk if needed).
    acc_ref[...] += jnp.sum(seq_ref[...].astype(jnp.float32), axis=1)

    @pl.when(s == pl.num_programs(1) - 1)
    def _():
        # pooled_output = mean over sequence dim (torch.mean(sequence_output, dim=1))
        pooled = acc_ref[...] * inv_seq_len                          # [BB, H] f32

        # Linear(hidden, 256) + ReLU  (f32 accumulation on the MXU)
        h = jnp.dot(pooled, w1_ref[...],
                    preferred_element_type=jnp.float32) + b1_ref[...]
        h = jnp.maximum(h, 0.0)

        # Dropout(0.1): identity in eval/inference mode.
        # TODO(synk): training-mode dropout (random mask + 1/(1-p) scale) not emitted.

        # Linear(256, num_labels) -- output lanes padded to 128 for dense stores.
        out_ref[...] = jnp.dot(h, w2_ref[...],
                               preferred_element_type=jnp.float32) + b2_ref[...]


def protein_classifier_head(sequence_output, w1, b1, w2, b2,
                            *, bb_max=8, st_max=512):
    """Pallas call: streamed mean-pool + 2-layer MLP classifier head."""
    B, S, H = sequence_output.shape
    mlp = w1.shape[1]
    L = w2.shape[1]

    Lp = _round_up(max(L, 128), 128)       # 2 -> 128 : lane-dense output stores

    # Batch tiling: avoid padding the big activation tensor when B is small.
    if B <= bb_max:
        BB, Bp = B, B
    else:
        BB = bb_max
        Bp = _round_up(B, BB)

    # Seq tiling: single full-S block when it fits; otherwise stream st_max chunks.
    if S <= st_max:
        ST, Sp = S, S
    else:
        ST = st_max
        Sp = _round_up(S, ST)

    seq = sequence_output
    if (Bp, Sp) != (B, S):
        # Zero padding is inert: padded seq positions add 0 to the sum (we divide
        # by the true S) and padded batch rows are sliced off below.
        seq = jnp.pad(seq, ((0, Bp - B), (0, Sp - S), (0, 0)))

    b1p = jnp.reshape(b1, (1, mlp)).astype(jnp.float32)
    w2p = jnp.pad(w2, ((0, 0), (0, Lp - L)))                          # tiny pad
    b2p = jnp.pad(jnp.reshape(b2, (1, L)), ((0, 0), (0, Lp - L))).astype(jnp.float32)

    kernel = functools.partial(classifier_head_kernel, inv_seq_len=1.0 / S)

    out = pl.pallas_call(
        kernel,
        out_shape=jax.ShapeDtypeStruct((Bp, Lp), jnp.float32),
        grid_spec=pltpu.PrefetchScalarGridSpec(
            num_scalar_prefetch=0,
            grid=(Bp // BB, Sp // ST),     # (batch tiles [parallel], seq tiles [reduce])
            in_specs=[
                pl.BlockSpec((BB, ST, H), lambda i, s: (i, s, 0)),    # streamed
                pl.BlockSpec((H, mlp),    lambda i, s: (0, 0)),       # grid-invariant
                pl.BlockSpec((1, mlp),    lambda i, s: (0, 0)),
                pl.BlockSpec((mlp, Lp),   lambda i, s: (0, 0)),
                pl.BlockSpec((1, Lp),     lambda i, s: (0, 0)),
            ],
            out_specs=pl.BlockSpec((BB, Lp), lambda i, s: (i, 0)),
            scratch_shapes=[pltpu.VMEM((BB, H), jnp.float32)],        # pooled-sum acc
        ),
        compiler_params=pltpu.CompilerParams(
            dimension_semantics=("parallel", "arbitrary")),
    )(seq, w1, b1p, w2p, b2p)

    # Drop batch / label padding.
    return out[:B, :L]


def reference_head(sequence_output, w1, b1, w2, b2):
    # Pure-JAX reference mirroring the module: mean-pool -> Linear -> ReLU ->
    # Dropout(identity) -> Linear, all in f32.
    pooled = jnp.mean(sequence_output.astype(jnp.float32), axis=1)
    h = jnp.maximum(jnp.dot(pooled, w1) + b1.reshape(1, -1), 0.0)
    return jnp.dot(h, w2) + b2.reshape(1, -1)


if __name__ == "__main__":
    key = jax.random.PRNGKey(0)
    k_emb, k_w1, k_b1, k_w2, k_b2, k_ids = jax.random.split(key, 6)

    B, S = 2, 8  # small batch=2, seq=8

    # ---- deterministic parameter init (shapes from the module __init__) ----
    # Stand-in embedding table for the pretrained ESM model's output.
    emb_table = jax.random.normal(k_emb, (VOCAB, HIDDEN), jnp.float32) * 0.02
    # classifier[0]: Linear(hidden_size=320, 256); stored as [in, out]
    w1 = jax.random.normal(k_w1, (HIDDEN, MLP), jnp.float32) * (1.0 / HIDDEN ** 0.5)
    b1 = jax.random.normal(k_b1, (1, MLP), jnp.float32) * 0.01
    # classifier[3]: Linear(256, num_labels); stored as [in, out]
    w2 = jax.random.normal(k_w2, (MLP, NUM_LABELS), jnp.float32) * (1.0 / MLP ** 0.5)
    b2 = jax.random.normal(k_b2, (1, NUM_LABELS), jnp.float32) * 0.01

    # ---- inputs ----
    input_ids = jax.random.randint(k_ids, (B, S), 0, VOCAB, jnp.int32)
    attention_mask = jnp.ones((B, S), jnp.int32)
    # TODO(synk): attention_mask only affects the (untranslated) ESM encoder; the
    #             reference torch.mean pools over all positions, so it is unused here.

    # Glue: stand-in for `outputs[0]` (sequence_output) of the pretrained model.
    sequence_output = jnp.take(emb_table, input_ids, axis=0)   # [B, S, HIDDEN]

    logits = protein_classifier_head(sequence_output, w1, b1, w2, b2)
    logits = jax.block_until_ready(logits)

    ref = reference_head(sequence_output, w1, b1, w2, b2)
    assert logits.shape == (B, NUM_LABELS)
    assert jnp.allclose(logits, ref, atol=1e-3, rtol=1e-2), "mismatch vs reference"

    print("KERNEL_OK")
</pallas_src>

<mosaic_0001>
module attributes {stable_mosaic.version = 11 : i64} {
  func.func @classifier_head_kernel(%arg0: i32, %arg1: i32, %arg2: memref<2x8x320xf32, #tpu.memory_space<vmem>>, %arg3: memref<320x256xf32, #tpu.memory_space<vmem>>, %arg4: memref<1x256xf32, #tpu.memory_space<vmem>>, %arg5: memref<256x128xf32, #tpu.memory_space<vmem>>, %arg6: memref<1x128xf32, #tpu.memory_space<vmem>>, %arg7: memref<2x128xf32, #tpu.memory_space<vmem>>, %arg8: memref<2x320xf32, #tpu.memory_space<vmem>>) attributes {dimension_semantics = [#tpu.dimension_semantics<parallel>, #tpu.dimension_semantics<arbitrary>], iteration_bounds = array<i64: 1, 1>, scalar_prefetch = 0 : i64, scratch_operands = 1 : i64, tpu.core_type = #tpu.core_type<tc>, window_params = [{transform_indices = @transform_0, window_bounds = array<i64: 2, 8, 320>}, {pipeline_mode = #tpu.pipeline_mode<synchronous>, transform_indices = @transform_1, window_bounds = array<i64: 320, 256>}, {pipeline_mode = #tpu.pipeline_mode<synchronous>, transform_indices = @transform_2, window_bounds = array<i64: 1, 256>}, {pipeline_mode = #tpu.pipeline_mode<synchronous>, transform_indices = @transform_3, window_bounds = array<i64: 256, 128>}, {pipeline_mode = #tpu.pipeline_mode<synchronous>, transform_indices = @transform_4, window_bounds = array<i64: 1, 128>}, {transform_indices = @transform_5, window_bounds = array<i64: 2, 128>}]} {
    %c0_i32 = arith.constant 0 : i32
    %0 = arith.cmpi eq, %arg1, %c0_i32 : i32
    %1 = arith.extui %0 : i1 to i32
    %c0_i32_0 = arith.constant 0 : i32
    %2 = arith.cmpi ne, %1, %c0_i32_0 : i32
    scf.if %2 {
      %cst_9 = arith.constant 0.000000e+00 : f32
      %11 = vector.broadcast %cst_9 : f32 to vector<2x320xf32>
      %c0_10 = arith.constant 0 : index
      %c0_11 = arith.constant 0 : index
      %12 = vector.load %arg8[%c0_10, %c0_11] : memref<2x320xf32, #tpu.memory_space<vmem>>, vector<2x320xf32>
      tpu.vector_store %arg8[%c0_10, %c0_11], %11 {strides = array<i32>} : memref<2x320xf32, #tpu.memory_space<vmem>>, vector<2x320xf32>,
    } else {
    }
    %c0 = arith.constant 0 : index
    %c0_1 = arith.constant 0 : index
    %3 = vector.load %arg8[%c0, %c0_1] : memref<2x320xf32, #tpu.memory_space<vmem>>, vector<2x320xf32>
    %c0_2 = arith.constant 0 : index
    %c0_3 = arith.constant 0 : index
    %c0_4 = arith.constant 0 : index
    %4 = vector.load %arg2[%c0_2, %c0_3, %c0_4] : memref<2x8x320xf32, #tpu.memory_space<vmem>>, vector<2x8x320xf32>
    %cst = arith.constant dense<0.000000e+00> : vector<2x320xf32>
    %5 = vector.multi_reduction <add>, %4, %cst [1] : vector<2x8x320xf32> to vector<2x320xf32>
    %6 = arith.addf %3, %5 : vector<2x320xf32>
    %c0_5 = arith.constant 0 : index
    %c0_6 = arith.constant 0 : index
    %7 = vector.load %arg8[%c0_5, %c0_6] : memref<2x320xf32, #tpu.memory_space<vmem>>, vector<2x320xf32>
    tpu.vector_store %arg8[%c0_5, %c0_6], %6 {strides = array<i32>} : memref<2x320xf32, #tpu.memory_space<vmem>>, vector<2x320xf32>,
    %c0_i32_7 = arith.constant 0 : i32
    %8 = arith.cmpi eq, %arg1, %c0_i32_7 : i32
    %9 = arith.extui %8 : i1 to i32
    %c0_i32_8 = arith.constant 0 : i32
    %10 = arith.cmpi ne, %9, %c0_i32_8 : i32
    scf.if %10 {
      %c0_9 = arith.constant 0 : index
      %c0_10 = arith.constant 0 : index
      %11 = vector.load %arg8[%c0_9, %c0_10] : memref<2x320xf32, #tpu.memory_space<vmem>>, vector<2x320xf32>
      %cst_11 = arith.constant 1.250000e-01 : f32
      %12 = vector.broadcast %cst_11 : f32 to vector<2x320xf32>
      %13 = arith.mulf %11, %12 : vector<2x320xf32>
      %c0_12 = arith.constant 0 : index
      %c0_13 = arith.constant 0 : index
      %14 = vector.load %arg3[%c0_12, %c0_13] : memref<320x256xf32, #tpu.memory_space<vmem>>, vector<320x256xf32>
      %cst_14 = arith.constant dense<0.000000e+00> : vector<2x256xf32>
      %15 = tpu.matmul %13, %14, %cst_14 {dimension_numbers = #tpu.dot_dimension_numbers<[1], [0], [0], [1], [0, 0, 1, 1], [], []>} : vector<2x320xf32>, vector<320x256xf32>, vector<2x256xf32> -> vector<2x256xf32>
      %c0_15 = arith.constant 0 : index
      %c0_16 = arith.constant 0 : index
      %16 = vector.load %arg4[%c0_15, %c0_16] : memref<1x256xf32, #tpu.memory_space<vmem>>, vector<1x256xf32>
      %17 = vector.broadcast %16 : vector<1x256xf32> to vector<2x256xf32>
      %18 = arith.addf %15, %17 : vector<2x256xf32>
      %cst_17 = arith.constant 0.000000e+00 : f32
      %19 = vector.broadcast %cst_17 : f32 to vector<2x256xf32>
      %20 = arith.maximumf %18, %19 : vector<2x256xf32>
      %c0_18 = arith.constant 0 : index
      %c0_19 = arith.constant 0 : index
      %21 = vector.load %arg5[%c0_18, %c0_19] : memref<256x128xf32, #tpu.memory_space<vmem>>, vector<256x128xf32>
      %cst_20 = arith.constant dense<0.000000e+00> : vector<2x128xf32>
      %22 = tpu.matmul %20, %21, %cst_20 {dimension_numbers = #tpu.dot_dimension_numbers<[1], [0], [0], [1], [0, 0, 1, 1], [], []>} : vector<2x256xf32>, vector<256x128xf32>, vector<2x128xf32> -> vector<2x128xf32>
      %c0_21 = arith.constant 0 : index
      %c0_22 = arith.constant 0 : index
      %23 = vector.load %arg6[%c0_21, %c0_22] : memref<1x128xf32, #tpu.memory_space<vmem>>, vector<1x128xf32>
      %24 = vector.broadcast %23 : vector<1x128xf32> to vector<2x128xf32>
      %25 = arith.addf %22, %24 : vector<2x128xf32>
      %c0_23 = arith.constant 0 : index
      %c0_24 = arith.constant 0 : index
      %26 = vector.load %arg7[%c0_23, %c0_24] : memref<2x128xf32, #tpu.memory_space<vmem>>, vector<2x128xf32>
      tpu.vector_store %arg7[%c0_23, %c0_24], %25 {strides = array<i32>} : memref<2x128xf32, #tpu.memory_space<vmem>>, vector<2x128xf32>,
    } else {
    }
    return
  }
  func.func @transform_0(%arg0: i32, %arg1: i32) -> (i32, i32, i32) {
    %c0_i32 = arith.constant 0 : i32
    %c0_i32_0 = arith.constant 0 : i32
    return %arg0, %arg1, %c0_i32 : i32, i32, i32
  }
  func.func @transform_1(%arg0: i32, %arg1: i32) -> (i32, i32) {
    %c0_i32 = arith.constant 0 : i32
    %c0_i32_0 = arith.constant 0 : i32
    %c0_i32_1 = arith.constant 0 : i32
    return %c0_i32, %c0_i32_0 : i32, i32
  }
  func.func @transform_2(%arg0: i32, %arg1: i32) -> (i32, i32) {
    %c0_i32 = arith.constant 0 : i32
    %c0_i32_0 = arith.constant 0 : i32
    %c0_i32_1 = arith.constant 0 : i32
    return %c0_i32, %c0_i32_0 : i32, i32
  }
  func.func @transform_3(%arg0: i32, %arg1: i32) -> (i32, i32) {
    %c0_i32 = arith.constant 0 : i32
    %c0_i32_0 = arith.constant 0 : i32
    %c0_i32_1 = arith.constant 0 : i32
    return %c0_i32, %c0_i32_0 : i32, i32
  }
  func.func @transform_4(%arg0: i32, %arg1: i32) -> (i32, i32) {
    %c0_i32 = arith.constant 0 : i32
    %c0_i32_0 = arith.constant 0 : i32
    %c0_i32_1 = arith.constant 0 : i32
    return %c0_i32, %c0_i32_0 : i32, i32
  }
  func.func @transform_5(%arg0: i32, %arg1: i32) -> (i32, i32) {
    %c0_i32 = arith.constant 0 : i32
    %c0_i32_0 = arith.constant 0 : i32
    return %arg0, %c0_i32 : i32, i32
  }
}

</mosaic_0001>

<bundles_post_ra>
// kernel: tpu_custom_call.1
= control target key start
LH: loop header
LB: loop body
LE: loop exit
PB: predicated region body
PF: predicated region fallthrough
CT: control target
= control target key end

     0   :  { %10 = vsyncpa [#allocation4], 0  ;;  %s947_s0 = inlined_call_operand.hbm [shape: f32[2,8,320], index: 0, kind: input, shape index: {}]   ;;  %s948_s1 = inlined_call_operand.hbm [shape: f32[320,256], index: 1, kind: input, shape index: {}]   ;;  %s949_s2 = inlined_call_operand.vmem [shape: f32[1,256], index: 2, kind: input, shape index: {}]   ;;  %s950_s3 = inlined_call_operand.hbm [shape: f32[256,128], index: 3, kind: input, shape index: {}]   ;;  %s951_s4 = inlined_call_operand.vmem [shape: f32[1,128], index: 4, kind: input, shape index: {}]   ;;  %s952_s5 = inlined_call_operand.hbm [shape: f32[2,128], index: 5, kind: output, shape index: {}]  }
   0x1   :  { %11 = vsyncpa [#allocation7], 0 }
   0x2   :  { %12 = vsyncpa [#allocation5], 0  ;;  %s824_s18 = smov [#allocation6]   ;;  %s730_s22 = scalar_lea.hbm %s948_s1, 10240 }
   0x3   :  { %s30_s19 = sshll.u32 %s824_s18, 4  ;;  %p731_p0 = scmp.ne.s32.totalorder %s948_s1, %s730_s22  ;;  %s31_s19 = int_to_ptr.vmem [resolvable:$true] %s30_s19 }
   0x4   :  { %p734_p1 = scmp.lt.u32.totalorder %s730_s22, %s948_s1 }
   0x6   :  { %p736_p2 = pnand %p734_p1, %p731_p0 }
   0x8   :  { %739 = shalt.err (!%p736_p2)
}
   0x9   :  { %s740_s27 = scalar_lea.vmem %s31_s19, 10240  ;;  %p745_p4 = scmp.lt.s32.totalorder %s31_s19, %s31_s19 }
   0xa   :  { %p741_p3 = scmp.ne.s32.totalorder %s31_s19, %s740_s27  ;;  %p746_p5 = scmp.lt.s32.totalorder %s740_s27, %s740_s27 }
   0xc   :  { %p747_p6 = por %p746_p5, %p745_p4 }
   0xe   :  { %p748_p7 = pnand %p747_p6, %p741_p3 }
  0x10   :  { %751 = shalt.err (!%p748_p7)
}
  0x11   :  { %s825_s28 = smov 256   ;;  %s826_s29 = smov 16  }
  0x12   :  { %36 = dma.hbm_to_vmem [thread:$0]  %s948_s1, 10240, %s31_s19, [#allocation7], %s825_s28, %s825_s28, %s826_s29  }
  0x13   :  { %s827_s7 = smov [#allocation3]   ;;  %s752_s11 = scalar_lea.hbm %s947_s0, 768 }
  0x14   :  { %s18_s8 = sshll.u32 %s827_s7, 4  ;;  %p753_p8 = scmp.ne.s32.totalorder %s947_s0, %s752_s11  ;;  %s19_s8 = int_to_ptr.vmem [resolvable:$true] %s18_s8 }
  0x15   :  { %p756_p9 = scmp.lt.u32.totalorder %s752_s11, %s947_s0 }
  0x17   :  { %p758_p10 = pnand %p756_p9, %p753_p8 }
  0x19   :  { %761 = shalt.err (!%p758_p10)
}
  0x1a   :  { %s762_s16 = scalar_lea.vmem %s19_s8, 768  ;;  %p767_p12 = scmp.lt.s32.totalorder %s19_s8, %s19_s8 }
  0x1b   :  { %p763_p11 = scmp.ne.s32.totalorder %s19_s8, %s762_s16  ;;  %p768_p13 = scmp.lt.s32.totalorder %s762_s16, %s762_s16 }
  0x1d   :  { %p769_p0 = por %p768_p13, %p767_p12 }
  0x1f   :  { %p770_p1 = pnand %p769_p0, %p763_p11 }
  0x21   :  { %773 = shalt.err (!%p770_p1)
}
  0x22   :  { %s828_s1 = smov 384   ;;  %s829_s17 = smov 24  }
  0x23   :  { %24 = dma.hbm_to_vmem [thread:$0]  %s947_s0, 768, %s19_s8, [#allocation4], %s828_s1, %s828_s1, %s829_s17  }
  0x24   :  { %s830_s20 = smov [#allocation8]   ;;  %s774_s24 = scalar_lea.hbm %s950_s3, 4096 }
  0x25   :  { %s44_s21 = sshll.u32 %s830_s20, 4  ;;  %p775_p2 = scmp.ne.s32.totalorder %s950_s3, %s774_s24  ;;  %s45_s21 = int_to_ptr.vmem [resolvable:$true] %s44_s21 }
  0x26   :  { %p778_p3 = scmp.lt.u32.totalorder %s774_s24, %s950_s3 }
  0x28   :  { %p780_p4 = pnand %p778_p3, %p775_p2 }
  0x2a   :  { %783 = shalt.err (!%p780_p4)
}
  0x2b   :  { %s784_s29 = scalar_lea.vmem %s45_s21, 4096  ;;  %p789_p6 = scmp.lt.s32.totalorder %s45_s21, %s45_s21 }
  0x2c   :  { %p785_p5 = scmp.ne.s32.totalorder %s45_s21, %s784_s29  ;;  %p790_p7 = scmp.lt.s32.totalorder %s784_s29, %s784_s29 }
  0x2e   :  { %p791_p8 = por %p790_p7, %p789_p6 }
  0x30   :  { %p792_p9 = pnand %p791_p8, %p785_p5 }
  0x32   :  { %795 = shalt.err (!%p792_p9)
}
  0x33   :  { %s831_s0 = smov 128   ;;  %s832_s30 = smov 8  }
  0x34   :  { %50 = dma.hbm_to_vmem [thread:$0]  %s950_s3, 4096, %s45_s21, [#allocation7], %s831_s0, %s831_s0, %s832_s30  }
  0x35   :  { %818 = dma.done.wait [#allocation4], 768  }
  0x36   :  { %819 = vsyncadd [#allocation4], 4294966528 }
  0x37   :  { %820 = dma.done.wait [#allocation7], 14336  }
  0x38   :  { %821 = vsyncadd [#allocation7], 4294952960  ;;  %vm66_vm0 = vcmask 1041408   ;;  %vm67_vm1 = vcmask 1043458   ;;  %vm69_vm2 = vcmask 521220   ;;  %v833_v0 = vmov 0.0  }
  0x39   :  { %vm68_vm3 = vmor %vm67_vm1, %vm66_vm0  ;;  %430 = vmatprep.mubr.f32.mxu1 %v833_v0  ;;  %v183_v2 = vld [vmem:[#allocation6 + $0x8] sm:$0xff]  ;;  %v185_v3 = vld [vmem:[#allocation6 + $0x18] sm:$0xff]  ;;  %vm91_vm5 = vcmask 523264   ;;  %vm161_vm6 = vcmask 1041409   ;;  %vm163_vm7 = vcmask 1043459   ;;  %vm165_vm8 = vcmask 1045509  }
  0x3a   :  { %vm902_vm4 = vmor %vm69_vm2, %vm68_vm3  ;;  %v182_v4 = vld [vmem:[#allocation6] sm:$0xff]  ;;  %v602_v5 = vpack.c.bf16 %v185_v3, %v183_v2  ;;  %v184_v6 = vld [vmem:[#allocation6 + $0x10] sm:$0xff]  ;;  %vm167_vm9 = vcmask 1047559  }
  0x3b   :  { %71 = vst.msk [vmem:[#allocation2] sm:$0x3f] %vm902_vm4, %v833_v0  ;;  %v187_v7 = vld [vmem:[#allocation6 + $0x28] sm:$0xff]  ;;  %v189_v8 = vld [vmem:[#allocation6 + $0x38] sm:$0xff]  ;;  %v604_v9 = vpack.c.bf16 %v184_v6, %v182_v4  ;;  %v186_v11 = vld [vmem:[#allocation6 + $0x20] sm:$0xff] }
  0x3c   :  { %v606_v10 = vpack.c.bf16 %v189_v8, %v187_v7  ;;  %v188_v12 = vld [vmem:[#allocation6 + $0x30] sm:$0xff]  ;;  %v191_v13 = vld [vmem:[#allocation6 + $0x48] sm:$0xff]  ;;  %603 = vmatprep.subr.bf16.mxu0 %v602_v5  ;;  %v193_v14 = vld [vmem:[#allocation6 + $0x58] sm:$0xff] }
  0x3d   :  { %605 = vmatpush1.bf16.msra.mxu0 %v604_v9  ;;  %v608_v15 = vpack.c.bf16 %v188_v12, %v186_v11  ;;  %v610_v16 = vpack.c.bf16 %v193_v14, %v191_v13  ;;  %v190_v17 = vld [vmem:[#allocation6 + $0x40] sm:$0xff]  ;;  %v192_v18 = vld [vmem:[#allocation6 + $0x50] sm:$0xff]  ;;  %v195_v19 = vld [vmem:[#allocation6 + $0x68] sm:$0xff] }
  0x3e   :  { %607 = vmatprep.subr.bf16.mxu0 %v606_v10  ;;  %v197_v20 = vld [vmem:[#allocation6 + $0x78] sm:$0xff]  ;;  %v612_v21 = vpack.c.bf16 %v192_v18, %v190_v17  ;;  %v194_v23 = vld [vmem:[#allocation6 + $0x60] sm:$0xff]  ;;  %v196_v24 = vld [vmem:[#allocation6 + $0x70] sm:$0xff]  ;;  %v834_v18 = vmov 1983009808  }
  0x3f   :  { %v614_v22 = vpack.c.bf16 %v197_v20, %v195_v19  ;;  %v199_v25 = vld [vmem:[#allocation6 + $0x88] sm:$0xff]  ;;  %v201_v26 = vld [vmem:[#allocation6 + $0x98] sm:$0xff]  ;;  %v616_v27 = vpack.c.bf16 %v196_v24, %v194_v23  ;;  %v198_v29 = vld [vmem:[#allocation6 + $0x80] sm:$0xff]  ;;  %v908_v19 = vunpack.c.l.s4 %v834_v18  ;;  %v128_v20 = vlaneseq }
  0x40   :  { %v618_v28 = vpack.c.bf16 %v201_v26, %v199_v25  ;;  %v200_v30 = vld [vmem:[#allocation6 + $0x90] sm:$0xff]  ;;  %v203_v31 = vld [vmem:[#allocation6 + $0xa8] sm:$0xff]  ;;  %v205_v32 = vld [vmem:[#allocation6 + $0xb8] sm:$0xff] }
  0x41   :  { %609 = vmatpush1.bf16.msra.mxu0 %v608_v15  ;;  %v620_v33 = vpack.c.bf16 %v200_v30, %v198_v29  ;;  %v202_v34 = vld [vmem:[#allocation6 + $0xa0] sm:$0xff]  ;;  %v204_v35 = vld [vmem:[#allocation6 + $0xb0] sm:$0xff]  ;;  %v622_v36 = vpack.c.bf16 %v205_v32, %v203_v31  ;;  %v207_v37 = vld [vmem:[#allocation6 + $0xc8] sm:$0xff] }
  0x42   :  { %611 = vmatprep.subr.bf16.mxu0 %v610_v16  ;;  %v247_v38 = vld [vmem:[#allocation6 + $0x208] sm:$0xff]  ;;  %v249_v39 = vld [vmem:[#allocation6 + $0x218] sm:$0xff]  ;;  %v246_v42 = vld [vmem:[#allocation6 + $0x200] sm:$0xff]  ;;  %v624_v46 = vpack.c.bf16 %v204_v35, %v202_v34 }
  0x43   :  { %v209_v40 = vld [vmem:[#allocation6 + $0xd8] sm:$0xff]  ;;  %v666_v41 = vpack.c.bf16 %v249_v39, %v247_v38  ;;  %v248_v43 = vld [vmem:[#allocation6 + $0x210] sm:$0xff]  ;;  %v206_v44 = vld [vmem:[#allocation6 + $0xc0] sm:$0xff] }
  0x44   :  { %v668_v45 = vpack.c.bf16 %v248_v43, %v246_v42  ;;  %v251_v47 = vld [vmem:[#allocation6 + $0x228] sm:$0xff]  ;;  %v253_v48 = vld [vmem:[#allocation6 + $0x238] sm:$0xff]  ;;  %v250_v49 = vld [vmem:[#allocation6 + $0x220] sm:$0xff]  ;;  %v626_v50 = vpack.c.bf16 %v209_v40, %v207_v37  ;;  %v912_v43 = vshrl.u32 %v128_v20, 7 }
  0x45   :  { %613 = vmatpush1.bf16.msra.mxu0 %v612_v21  ;;  %667 = vmatprep.subr.bf16.mxu1 %v666_v41  ;;  %v208_v51 = vld [vmem:[#allocation6 + $0xd0] sm:$0xff]  ;;  %v211_v52 = vld [vmem:[#allocation6 + $0xe8] sm:$0xff]  ;;  %v670_v53 = vpack.c.bf16 %v253_v48, %v251_v47  ;;  %v213_v55 = vld [vmem:[#allocation6 + $0xf8] sm:$0xff] }
  0x46   :  { %615 = vmatprep.subr.bf16.mxu0 %v614_v22  ;;  %669 = vmatpush1.bf16.msra.mxu1 %v668_v45  ;;  %v252_v54 = vld [vmem:[#allocation6 + $0x230] sm:$0xff]  ;;  %v210_v56 = vld [vmem:[#allocation6 + $0xe0] sm:$0xff]  ;;  %v255_v58 = vld [vmem:[#allocation6 + $0x248] sm:$0xff]  ;;  %v628_v62 = vpack.c.bf16 %v208_v51, %v206_v44  ;;  %v630_v4 = vpack.c.bf16 %v213_v55, %v211_v52 }
  0x47   :  { %v672_v57 = vpack.c.bf16 %v252_v54, %v250_v49  ;;  %671 = vmatprep.subr.bf16.mxu1 %v670_v53  ;;  %v257_v59 = vld [vmem:[#allocation6 + $0x258] sm:$0xff]  ;;  %v254_v60 = vld [vmem:[#allocation6 + $0x240] sm:$0xff]  ;;  %v256_v61 = vld [vmem:[#allocation6 + $0x250] sm:$0xff] }
  0x48   :  { %v212_v63 = vld [vmem:[#allocation6 + $0xf0] sm:$0xff]  ;;  %v215_v0 = vld [vmem:[#allocation6 + $0x108] sm:$0xff]  ;;  %v217_v2 = vld [vmem:[#allocation6 + $0x118] sm:$0xff]  ;;  %v674_v3 = vpack.c.bf16 %v257_v59, %v255_v58  ;;  %v676_v5 = vpack.c.bf16 %v256_v61, %v254_v60  ;;  %v127_v59 = vunpack.c.0.s8 %v908_v19 }
  0x49   :  { %617 = vmatpush1.bf16.msra.mxu0 %v616_v27  ;;  %v259_v6 = vld [vmem:[#allocation6 + $0x268] sm:$0xff]  ;;  %v261_v7 = vld [vmem:[#allocation6 + $0x278] sm:$0xff]  ;;  %v258_v9 = vld [vmem:[#allocation6 + $0x260] sm:$0xff]  ;;  %v632_v11 = vpack.c.bf16 %v212_v63, %v210_v56  ;;  %v634_v12 = vpack.c.bf16 %v217_v2, %v215_v0 }
  0x4a   :  { %619 = vmatprep.subr.bf16.mxu0 %v618_v28  ;;  %673 = vmatpush1.bf16.msra.mxu1 %v672_v57  ;;  %v678_v8 = vpack.c.bf16 %v261_v7, %v259_v6  ;;  %v260_v10 = vld [vmem:[#allocation6 + $0x270] sm:$0xff]  ;;  %v214_v13 = vld [vmem:[#allocation6 + $0x100] sm:$0xff]  ;;  %v74_v16 = vld [vmem:[#allocation3 + $0x8] sm:$0xff] }
  0x4b   :  { %675 = vmatprep.subr.bf16.mxu1 %v674_v3  ;;  %v216_v14 = vld [vmem:[#allocation6 + $0x110] sm:$0xff]  ;;  %v75_v17 = vld [vmem:[#allocation3 + $0x10] sm:$0xff]  ;;  %v680_v21 = vpack.c.bf16 %v260_v10, %v258_v9  ;;  %v76_v22 = vld [vmem:[#allocation3 + $0x18] sm:$0xff]  ;;  %v85_v26 = vrot.slane %v74_v16, 4 }
  0x4c   :  { %v73_v15 = vld [vmem:[#allocation3] sm:$0xff]  ;;  %v78_v24 = vld [vmem:[#allocation3 + $0x28] sm:$0xff]  ;;  %v92_v27 = vsel %vm91_vm5, %v75_v17, 0.0  ;;  %v99_v29 = vrot.slane %v76_v22, 4  ;;  %v455_v32 = vld [vmem:[#allocation8 + $0x80] sm:$0xff]  ;;  %v636_v44 = vpack.c.bf16 %v216_v14, %v214_v13 }
  0x4d   :  { %621 = vmatpush1.bf16.msra.mxu0 %v620_v33  ;;  %v77_v23 = vld [vmem:[#allocation3 + $0x20] sm:$0xff]  ;;  %v79_v25 = vrot.slane %v73_v15, 4  ;;  %v93_v28 = vrot.slane %v92_v27, 4  ;;  %v111_v31 = vsel %vm91_vm5, %v78_v24, 0.0  ;;  %v456_v33 = vld [vmem:[#allocation8 + $0x88] sm:$0xff]  ;;  %v221_v35 = vld [vmem:[#allocation6 + $0x138] sm:$0xff]  ;;  %v86_v37 = vadd.f32 %v85_v26, %v74_v16 }
  0x4e   :  { %623 = vmatprep.subr.bf16.mxu0 %v622_v36  ;;  %677 = vmatpush1.bf16.msra.mxu1 %v676_v5  ;;  %v105_v30 = vrot.slane %v77_v23, 4  ;;  %v219_v34 = vld [vmem:[#allocation6 + $0x128] sm:$0xff]  ;;  %v112_v38 = vrot.slane %v111_v31, 4  ;;  %v682_v39 = vpack.c.bf16 %v456_v33, %v455_v32  ;;  %v100_v41 = vadd.f32 %v99_v29, %v76_v22  ;;  %v218_v49 = vld [vmem:[#allocation6 + $0x120] sm:$0xff]  ;;  %v225_v55 = vld [vmem:[#allocation6 + $0x158] sm:$0xff] }
  0x4f   :  { %679 = vmatprep.subr.bf16.mxu1 %v678_v8  ;;  %v80_v36 = vadd.f32 %v79_v25, %v73_v15  ;;  %v94_v40 = vadd.f32 %v93_v28, %v92_v27  ;;  %v638_v48 = vpack.c.bf16 %v221_v35, %v219_v34  ;;  %v223_v54 = vld [vmem:[#allocation6 + $0x148] sm:$0xff]  ;;  %v222_v5 = vld [vmem:[#allocation6 + $0x140] sm:$0xff]  ;;  %v224_v6 = vld [vmem:[#allocation6 + $0x150] sm:$0xff]  ;;  %v916_v15 = vsub.s32 %v127_v59, %v912_v43 }
  0x50   :  { %v106_v42 = vadd.f32 %v105_v30, %v77_v23  ;;  %v113_v47 = vadd.f32 %v112_v38, %v111_v31  ;;  %v101_v52 = vrot.slane %v100_v41, 2  ;;  %v227_v10 = vld [vmem:[#allocation6 + $0x168] sm:$0xff]  ;;  %v644_v19 = vpack.c.bf16 %v224_v6, %v222_v5  ;;  %v226_v23 = vld [vmem:[#allocation6 + $0x160] sm:$0xff]  ;;  %v228_v24 = vld [vmem:[#allocation6 + $0x170] sm:$0xff] }
  0x51   :  { %625 = vmatpush1.bf16.msra.mxu0 %v624_v46  ;;  %v81_v45 = vrot.slane %v80_v36, 2  ;;  %v87_v46 = vrot.slane %v86_v37, 2  ;;  %v95_v51 = vrot.slane %v94_v40, 2  ;;  %v231_v27 = vld [vmem:[#allocation6 + $0x188] sm:$0xff]  ;;  %v233_v28 = vld [vmem:[#allocation6 + $0x198] sm:$0xff]  ;;  %v648_v32 = vpack.c.bf16 %v228_v24, %v226_v23  ;;  %v230_v34 = vld [vmem:[#allocation6 + $0x180] sm:$0xff] }
  0x52   :  { %627 = vmatprep.subr.bf16.mxu0 %v626_v50  ;;  %v220_v50 = vld [vmem:[#allocation6 + $0x130] sm:$0xff]  ;;  %681 = vmatpush1.bf16.msra.mxu1 %v680_v21  ;;  %v107_v53 = vrot.slane %v106_v42, 2  ;;  %v114_v58 = vrot.slane %v113_v47, 2  ;;  %v102_v61 = vadd.f32 %v101_v52, %v100_v41  ;;  %v650_v33 = vpack.c.bf16 %v233_v28, %v231_v27  ;;  %v235_v38 = vld [vmem:[#allocation6 + $0x1a8] sm:$0xff]  ;;  %v245_v59 = vld [vmem:[#allocation6 + $0x1f8] sm:$0xff] }
  0x53   :  { %v82_v56 = vadd.f32 %v81_v45, %v80_v36  ;;  %v88_v57 = vadd.f32 %v87_v46, %v86_v37  ;;  %683 = vmatprep.subr.bf16.mxu1 %v682_v39  ;;  %v96_v60 = vadd.f32 %v95_v51, %v94_v40  ;;  %v640_v63 = vpack.c.bf16 %v220_v50, %v218_v49  ;;  %v232_v35 = vld [vmem:[#allocation6 + $0x190] sm:$0xff]  ;;  %v237_v39 = vld [vmem:[#allocation6 + $0x1b8] sm:$0xff]  ;;  %v72_v49 = vld [vmem:[#allocation2] sm:$0x3f] }
  0x54   :  { %v115_v3 = vadd.f32 %v114_v58, %v113_v47  ;;  %v103_v8 = vrot.slane %v102_v61, 1  ;;  %v652_v41 = vpack.c.bf16 %v232_v35, %v230_v34  ;;  %v236_v45 = vld [vmem:[#allocation6 + $0x1b0] sm:$0xff]  ;;  %v239_v47 = vld [vmem:[#allocation6 + $0x1c8] sm:$0xff]  ;;  %v462_v23 = vld [vmem:[#allocation8 + $0xb8] sm:$0xff] }
  0x55   :  { %629 = vmatpush1.bf16.msra.mxu0 %v628_v62  ;;  %v108_v62 = vadd.f32 %v107_v53, %v106_v42  ;;  %v83_v0 = vrot.slane %v82_v56, 1  ;;  %v89_v2 = vrot.slane %v88_v57, 1  ;;  %v97_v7 = vrot.slane %v96_v60, 1  ;;  %v243_v58 = vld [vmem:[#allocation6 + $0x1e8] sm:$0xff]  ;;  %v457_v6 = vld [vmem:[#allocation8 + $0x90] sm:$0xff]  ;;  %v463_v27 = vld [vmem:[#allocation8 + $0xc0] sm:$0xff] }
  0x56   :  { %631 = vmatprep.subr.bf16.mxu0 %v630_v4  ;;  %v642_v4 = vpack.c.bf16 %v225_v55, %v223_v54  ;;  %v116_v14 = vrot.slane %v115_v3, 1  ;;  %v104_v17 = vadd.f32 %v103_v8, %v102_v61  ;;  %v654_v42 = vpack.c.bf16 %v237_v39, %v235_v38  ;;  %v238_v55 = vld [vmem:[#allocation6 + $0x1c0] sm:$0xff]  ;;  %v440_v5 = vld [vmem:[#allocation8 + $0x8] sm:$0xff]  ;;  %v466_v34 = vld [vmem:[#allocation8 + $0xd8] sm:$0xff] }
  0x57   :  { %v109_v9 = vrot.slane %v108_v62, 1  ;;  %v90_v13 = vadd.f32 %v89_v2, %v88_v57  ;;  %v98_v16 = vadd.f32 %v97_v7, %v96_v60  ;;  %v662_v61 = vpack.c.bf16 %v245_v59, %v243_v58  ;;  %v458_v7 = vld [vmem:[#allocation8 + $0x98] sm:$0xff]  ;;  %v464_v28 = vld [vmem:[#allocation8 + $0xc8] sm:$0xff] }
  0x58   :  { %v117_v20 = vadd.f32 %v116_v14, %v115_v3  ;;  %v442_v14 = vld [vmem:[#allocation8 + $0x18] sm:$0xff] }
  0x59   :  { %633 = vmatpush1.bf16.msra.mxu0 %v632_v11  ;;  %v229_v11 = vld [vmem:[#allocation6 + $0x178] sm:$0xff]  ;;  %v110_v18 = vadd.f32 %v109_v9, %v108_v62  ;;  %v138_v25 = vrot.slane %v98_v16, %v916_v15  ;;  %v242_v62 = vld [vmem:[#allocation6 + $0x1e0] sm:$0xff] }
  0x5a   :  { %635 = vmatprep.subr.bf16.mxu0 %v634_v12  ;;  %v84_v12 = vadd.f32 %v83_v0, %v82_v56  ;;  %v646_v22 = vpack.c.bf16 %v229_v11, %v227_v10  ;;  %v154_v30 = vrot.slane %v117_v20, %v916_v15  ;;  %v240_v56 = vld [vmem:[#allocation6 + $0x1d0] sm:$0xff]  ;;  %v459_v16 = vld [vmem:[#allocation8 + $0xa0] sm:$0xff]  ;;  %v450_v38 = vld [vmem:[#allocation8 + $0x58] sm:$0xff] }
  0x5b   :  { %v140_v26 = vcombine.low %v104_v17, %v110_v18  ;;  %v660_v60 = vpack.c.bf16 %v240_v56, %v238_v55  ;;  %v460_v17 = vld [vmem:[#allocation8 + $0xa8] sm:$0xff]  ;;  %v443_v20 = vld [vmem:[#allocation8 + $0x20] sm:$0xff]  ;;  %v270_v55 = vsub.s32 1, %v912_v43 }
  0x5c   :  { %v124_v21 = vcombine.low %v84_v12, %v90_v13  ;;  %v686_v12 = vpack.c.bf16 %v458_v7, %v457_v6  ;;  %v441_v13 = vld [vmem:[#allocation8 + $0x10] sm:$0xff]  ;;  %v566_v6 = vld [vmem:[%s951_s4] ss:$0 sm:$0xff] }
  0x5d   :  { %637 = vmatpush1.bf16.msra.mxu0 %v636_v44  ;;  %v147_v31 = vrot.slane %v140_v26, %v916_v15  ;;  %v234_v44 = vld [vmem:[#allocation6 + $0x1a0] sm:$0xff]  ;;  %v688_v18 = vpack.c.bf16 %v442_v14, %v441_v13  ;;  %v446_v26 = vld [vmem:[#allocation8 + $0x38] sm:$0xff] }
  0x5e   :  { %639 = vmatprep.subr.bf16.mxu0 %v638_v48  ;;  %v131_v29 = vrot.slane %v124_v21, %v916_v15  ;;  %v241_v48 = vld [vmem:[#allocation6 + $0x1d8] sm:$0xff]  ;;  %v656_v52 = vpack.c.bf16 %v236_v45, %v234_v44  ;;  %v444_v21 = vld [vmem:[#allocation8 + $0x28] sm:$0xff]  ;;  %v451_v44 = vld [vmem:[#allocation8 + $0x60] sm:$0xff] }
  0x5f   :  { %v155_v37 = vcombine.low %v147_v31, %v154_v30  ;;  %v658_v54 = vpack.c.bf16 %v241_v48, %v239_v47  ;;  %v692_v24 = vpack.c.bf16 %v444_v21, %v443_v20  ;;  %v698_v30 = vpack.c.bf16 %v464_v28, %v463_v27  ;;  %v447_v31 = vld [vmem:[#allocation8 + $0x40] sm:$0xff]  ;;  %v452_v45 = vld [vmem:[#allocation8 + $0x68] sm:$0xff]  ;;  %v469_v47 = vld [vmem:[#allocation8 + $0xf0] sm:$0xff] }
  0x60   :  { %v139_v36 = vcombine.low %v131_v29, %v138_v25  ;;  %v445_v25 = vld [vmem:[#allocation8 + $0x30] sm:$0xff]  ;;  %v470_v48 = vld [vmem:[#allocation8 + $0xf8] sm:$0xff] }
  0x61   :  { %641 = vmatpush1.bf16.msra.mxu0 %v640_v63  ;;  %v160_v40 = vrot.slane %v155_v37, 7  ;;  %v244_v63 = vld [vmem:[#allocation6 + $0x1f0] sm:$0xff]  ;;  %v696_v29 = vpack.c.bf16 %v446_v26, %v445_v25 }
  0x62   :  { %643 = vmatprep.subr.bf16.mxu0 %v642_v4  ;;  %v664_v0 = vpack.c.bf16 %v244_v63, %v242_v62  ;;  %v439_v4 = vld [vmem:[#allocation8] sm:$0xff]  ;;  %v449_v37 = vld [vmem:[#allocation8 + $0x50] sm:$0xff] }
  0x63   :  { %v162_v46 = vsel %vm161_vm6, %v160_v40, %v139_v36  ;;  %v684_v9 = vpack.c.bf16 %v440_v5, %v439_v4  ;;  %v704_v39 = vpack.c.bf16 %v450_v38, %v449_v37 }
  0x64   :  { %v164_v50 = vsel %vm163_vm7, %v160_v40, %v162_v46  ;;  %v708_v46 = vpack.c.bf16 %v452_v45, %v451_v44 }
  0x65   :  { %645 = vmatpush1.bf16.msra.mxu0 %v644_v19  ;;  %v166_v51 = vsel %vm165_vm8, %v160_v40, %v164_v50  ;;  %v690_v19 = vpack.c.bf16 %v460_v17, %v459_v16  ;;  %v453_v50 = vld [vmem:[#allocation8 + $0x70] sm:$0xff] }
  0x66   :  { %647 = vmatprep.subr.bf16.mxu0 %v646_v22  ;;  %v168_v53 = vsel %vm167_vm9, %v160_v40, %v166_v51  ;;  %v461_v22 = vld [vmem:[#allocation8 + $0xb0] sm:$0xff]  ;;  %v467_v40 = vld [vmem:[#allocation8 + $0xe0] sm:$0xff]  ;;  %v454_v51 = vld [vmem:[#allocation8 + $0x78] sm:$0xff] }
  0x67   :  { %v170_v57 = vadd.f32 %v168_v53, %v72_v49  ;;  %v710_v49 = vpack.c.bf16 %v470_v48, %v469_v47  ;;  %v266_v53 = vsub.s32 0, %v912_v43 }
  0x69   :  { %649 = vmatpush1.bf16.msra.mxu0 %v648_v32  ;;  %176 = vst.msk [vmem:[#allocation2] sm:$0x3f] %vm902_vm4, %v170_v57  ;;  %v448_v32 = vld [vmem:[#allocation8 + $0x48] sm:$0xff] }
  0x6a   :  { %651 = vmatprep.subr.bf16.mxu0 %v650_v33  ;;  %v465_v33 = vld [vmem:[#allocation8 + $0xd0] sm:$0xff]  ;;  %v700_v35 = vpack.c.bf16 %v448_v32, %v447_v31 }
  0x6b   :  { %v702_v36 = vpack.c.bf16 %v466_v34, %v465_v33 }
  0x6d   :  { %653 = vmatpush1.bf16.msra.mxu0 %v652_v41  ;;  %v468_v41 = vld [vmem:[#allocation8 + $0xe8] sm:$0xff] }
  0x6e   :  { %655 = vmatprep.subr.bf16.mxu0 %v654_v42  ;;  %v706_v42 = vpack.c.bf16 %v468_v41, %v467_v40 }
  0x70   :  { %v180_v2 = vld [vmem:[#allocation2] sm:$0x3f] }
  0x71   :  { %657 = vmatpush1.bf16.msra.mxu0 %v656_v52  ;;  %v181_v3 = vmul.f32 0.125, %v180_v2  ;;  %v712_v52 = vpack.c.bf16 %v454_v51, %v453_v50 }
  0x72   :  { %659 = vmatprep.subr.bf16.mxu0 %v658_v54  ;;  %v262_v54 = vld [vmem:[%s949_s2] sm:$0x3]  ;;  %s835_s2 = smov [#allocation9]  }
  0x73   :  { %v275_v8 = vcombine.high %v181_v3, %v181_v3  ;;  %v282_v1 = vrot.slane %v181_v3, %v916_v15  ;;  %v267_v56 = vrot.slane %v262_v54, %v266_v53  ;;  %v271_v57 = vrot.slane %v262_v54, %v270_v55  ;;  %s555_s11 = sshll.u32 %s835_s2, 4  ;;  %s556_s11 = int_to_ptr.vmem [resolvable:$true] %s555_s11 }
  0x74   :  { %s796_s12 = scalar_lea.vmem %s556_s11, 32  ;;  %p801_p11 = scmp.lt.s32.totalorder %s556_s11, %s556_s11 }
  0x75   :  { %661 = vmatpush1.bf16.msra.mxu0 %v660_v60  ;;  %v290_v10 = vcombine.high %v282_v1, %v282_v1  ;;  %v289_v11 = vrot.slane %v275_v8, %v916_v15  ;;  %v694_v15 = vpack.c.bf16 %v462_v23, %v461_v22  ;;  %p797_p10 = scmp.ne.s32.totalorder %s556_s11, %s796_s12  ;;  %p802_p12 = scmp.lt.s32.totalorder %s796_s12, %s796_s12 }
  0x76   :  { %663 = vmatprep.subr.bf16.mxu0 %v662_v61 }
  0x77   :  { %359 = vmatprep.mubr.f32.mxu0 %v290_v10  ;;  %565 = vmatmul.mubr.msk.f32.vlgmr.msra.gmra.mrb[0].mxu1 %vm91_vm5, %v289_v11  ;;  %p803_p13 = por %p802_p12, %p801_p11 }
  0x78   :  { %685 = vmatpush3.bf16.msra.mxu1 %v684_v9 }
  0x79   :  { %665 = vmatpush1.bf16.msra.mxu0 %v664_v0  ;;  %687 = vmatprep.subr.bf16.mxu1 %v686_v12  ;;  %p804_p0 = pnand %p803_p13, %p797_p10 }
  0x7c   :  { %360 = vmatmul.mubr.f32.vlgmr.msra.gmra.mrb[0].mxu0 %v282_v1  ;;  %689 = vmatpush3.bf16.msra.mxu1 %v688_v18 }
  0x7d   :  { %691 = vmatprep.subr.bf16.mxu1 %v690_v19 }
  0x80   :  { %693 = vmatpush3.bf16.msra.mxu1 %v692_v24 }
  0x81   :  { %695 = vmatprep.subr.bf16.mxu1 %v694_v15 }
  0x84   :  { %697 = vmatpush3.bf16.msra.mxu1 %v696_v29 }
  0x85   :  { %699 = vmatprep.subr.bf16.mxu1 %v698_v30 }
  0x88   :  { %701 = vmatpush3.bf16.msra.mxu1 %v700_v35 }
  0x89   :  { %703 = vmatprep.subr.bf16.mxu1 %v702_v36 }
  0x8c   :  { %705 = vmatpush3.bf16.msra.mxu1 %v704_v39 }
  0x8d   :  { %707 = vmatprep.subr.bf16.mxu1 %v706_v42 }
  0x90   :  { %709 = vmatpush3.bf16.msra.mxu1 %v708_v46 }
  0x91   :  { %711 = vmatprep.subr.bf16.mxu1 %v710_v49 }
  0x94   :  { %713 = vmatpush3.bf16.msra.mxu1 %v712_v52 }
 0x14a   :  { %v432_v58 = vpop.f32.mrb[0].mxu1 }
 0x14b   :  { %v434_v60 = vpop.f32.mrb[1].mxu1 }
 0x14f   :  { %v361_v59 = vpop.f32.mrb[0].mxu0 }
 0x150   :  { %v362_v61 = vadd.f32 %v361_v59, %v267_v56  ;;  %v363_v62 = vpop.f32.mrb[1].mxu0 }
 0x151   :  { %v364_v63 = vadd.f32 %v363_v62, %v271_v57 }
 0x152   :  { %v433_v0 = vadd.f32 %v432_v58, %v362_v61 }
 0x153   :  { %v435_v2 = vadd.f32 %v434_v60, %v364_v63 }
 0x154   :  { %v437_v4 = vmax.f32 %v433_v0, 0.0 }
 0x155   :  { %v438_v3 = vmax.f32 %v435_v2, 0.0 }
 0x157   :  { %542 = vmatprep.mubr.f32.mxu1 %v438_v3 }
 0x158   :  { %543 = vmatmul.mubr.f32.vlgmr.msra.gmra.mrb[2].mxu1 %v437_v4 }
 0x22b   :  { %v599_v5 = vpop.f32.mrb[2].mxu1 }
 0x22c   :  { %v600_v43 = vpop.f32.mrb[3].mxu1 }
 0x22d   :  { %v601_v7 = vadd.f32 %v600_v43, %v599_v5 }
 0x22f   :  { %v545_v8 = vadd.f32 %v601_v7, %v566_v6 }
 0x231   :  { %548 = vst [vmem:[#allocation9] sm:$0x3] %v545_v8 }
 0x232   :  { %807 = shalt.err (!%p804_p0)
}
 0x233   :  { %s808_s15 = scalar_lea.hbm %s952_s5, 32 }
 0x234   :  { %p809_p1 = scmp.ne.s32.totalorder %s952_s5, %s808_s15  ;;  %p812_p2 = scmp.lt.u32.totalorder %s808_s15, %s952_s5 }
 0x236   :  { %p814_p3 = pnand %p812_p2, %p809_p1 }
 0x238   :  { %817 = shalt.err (!%p814_p3)
}
 0x239   :  { %558 = dma.vmem_to_hbm [thread:$0]  %s556_s11, 32, %s952_s5, [#allocation5]  }
 0x23a   :  { %822 = dma.done.wait [#allocation5], 32  }
 0x23b   :  { %823 = vsyncadd [#allocation5], 4294967264 }
 0x23c   :  { %562 = vsyncpa [#allocation4], 1 }
 0x23d   :  { %563 = vsyncpa [#allocation7], 1 }
 0x23e   :  { %564 = vsyncpa [#allocation5], 1 }

</bundles_post_ra>
